<compile_context>
chip_gen: v6e
topology: v6e:2x2x1
jax: 0.10.0
libtpu: 0.0.40
codegen_flags: <defaults>
</compile_context>

<pallas_src>
import functools

import jax
import jax.numpy as jnp
from jax.experimental import pallas as pl
from jax.experimental.pallas import tpu as pltpu

INPUT_SIZE = 57
HIDDEN_SIZE = 64
OUT_SIZE = 18
GROUP = 128          # one 128-lane vreg group per gate (r | z | n) -> aligned slices
N_GATES = 3
HEAD_PAD = 128       # head output padded to a full 128-lane vreg (lane-dense store)


# ---------------------------------------------------------------------------
# Kernel 1: serial GRU recurrence. Only h @ W_hh (+ gate math) is on the
# critical path; the input projection arrives precomputed in xproj.
# ---------------------------------------------------------------------------
def _gru_recurrence_kernel(xproj_ref, h0_ref, w_hh_ref, b_hn_ref,
                           h_all_ref, h_scr, *, tt, hidden, group):
    @pl.when(pl.program_id(0) == 0)
    def _():
        h_scr[...] = h0_ref[...]

    w_hh = w_hh_ref[...]          # (64, 384) VMEM-resident across the whole grid
    b_hn = b_hn_ref[...]          # (1, 64) f32: b_hh_n (must sit inside the r* product)

    def step(i, h):
        xp = xproj_ref[i]         # (B, 384) f32: gi_r | gi_z | gi_n at lanes 0/128/256
        hp = jnp.dot(h.astype(w_hh.dtype), w_hh,
                     preferred_element_type=jnp.float32)               # (B, 384)
        r = jax.nn.sigmoid(xp[:, 0:hidden] + hp[:, 0:hidden])
        z = jax.nn.sigmoid(xp[:, group:group + hidden] + hp[:, group:group + hidden])
        gh_n = hp[:, 2 * group:2 * group + hidden] + b_hn
        n = jnp.tanh(xp[:, 2 * group:2 * group + hidden] + r * gh_n)
        h_new = (1.0 - z) * n + z * h
        h_all_ref[i] = h_new      # per-step hidden state -> output block
        return h_new

    h_final = jax.lax.fori_loop(0, tt, step, h_scr[...], unroll=True)
    h_scr[...] = h_final          # single carry write per TT-step block


# ---------------------------------------------------------------------------
# Kernel 2: fully parallel Linear head + log-softmax over all timesteps.
# Output is lane-dense (128 lanes); pad bias = -1e30 so pad lanes never
# influence the softmax; the wrapper slices back to OUT_SIZE.
# ---------------------------------------------------------------------------
def _head_kernel(h_ref, w_head_ref, b_head_ref, out_ref):
    tt, b, hd = h_ref.shape
    h = h_ref[...].reshape(tt * b, hd)
    logits = jnp.dot(h.astype(w_head_ref.dtype), w_head_ref[...],
                     preferred_element_type=jnp.float32) + b_head_ref[...]
    m = jnp.max(logits, axis=-1, keepdims=True)
    s = logits - m
    lse = jnp.log(jnp.sum(jnp.exp(s), axis=-1, keepdims=True))
    out_ref[...] = (s - lse).reshape(tt, b, HEAD_PAD)


def prepare_params(params, compute_dtype=jnp.bfloat16):
    """One-time weight packing (hoisted out of the per-call path).

    Returns:
      w_ih:   (57, 384) f32  input-projection weights (used by XLA outside loop)
      b_ih:   (1, 384)  f32  folded biases: r,z get b_ih+b_hh; n gets b_ih only
      w_hh:   (64, 384) compute_dtype  hidden-only per-step RHS (r|z|n at g*128)
      b_hn:   (1, 64)   f32  b_hh_n (added to gh_n before the r* multiply)
      w_head: (64, 128) compute_dtype  Linear head, outputs padded 18 -> 128
      b_head: (1, 128)  f32  pad lanes = -1e30
    """
    H, IN = HIDDEN_SIZE, INPUT_SIZE
    w_ih, w_hh = params["w_ih"], params["w_hh"]          # (3H, IN), (3H, H)
    b_ih, b_hh = params["b_ih"], params["b_hh"]          # (3H,), (3H,)

    w_ih_pack = jnp.zeros((IN, N_GATES * GROUP), jnp.float32)
    b_ih_pack = jnp.zeros((1, N_GATES * GROUP), jnp.float32)
    w_hh_pack = jnp.zeros((H, N_GATES * GROUP), jnp.float32)
    for g in range(N_GATES):                             # g: 0=r, 1=z, 2=n
        lo = g * GROUP
        w_ih_pack = w_ih_pack.at[:, lo:lo + H].set(w_ih[g * H:(g + 1) * H].T)
        w_hh_pack = w_hh_pack.at[:, lo:lo + H].set(w_hh[g * H:(g + 1) * H].T)
    # r and z: both biases fold into the precomputed input projection.
    b_ih_pack = b_ih_pack.at[0, 0 * GROUP:0 * GROUP + H].set(b_ih[:H] + b_hh[:H])
    b_ih_pack = b_ih_pack.at[0, 1 * GROUP:1 * GROUP + H].set(b_ih[H:2 * H] + b_hh[H:2 * H])
    # n: only b_ih_n folds; b_hh_n must stay inside r * (W_hn h + b_hn).
    b_ih_pack = b_ih_pack.at[0, 2 * GROUP:2 * GROUP + H].set(b_ih[2 * H:])
    b_hn = b_hh[2 * H:].reshape(1, H).astype(jnp.float32)

    w_head = jnp.zeros((H, HEAD_PAD), jnp.float32).at[:, :OUT_SIZE].set(params["w_lin"].T)
    b_head = jnp.full((1, HEAD_PAD), -1e30, jnp.float32).at[0, :OUT_SIZE].set(params["b_lin"])

    return {
        "w_ih": w_ih_pack,                           # stays f32 (outside the kernel)
        "b_ih": b_ih_pack,
        "w_hh": w_hh_pack.astype(compute_dtype),
        "b_hn": b_hn,
        "w_head": w_head.astype(compute_dtype),
        "b_head": b_head,
    }


def gru_sequence(x_seq, h0, packed, *, time_block=16):
    """x_seq: (T, B, 57); h0: (1, B, 64); packed: prepare_params() output.

    Returns (log_probs (T, B, 18) f32, hn (1, B, 64) f32).
    """
    T, B, _ = x_seq.shape
    H = HIDDEN_SIZE

    Bp = max(8, -(-B // 8) * 8)                      # pad batch to the f32 sublane tile
    TT = min(time_block, T)                          # timesteps per grid step
    Tp = pl.cdiv(T, TT) * TT                         # pad T to a multiple of TT

    x = x_seq.astype(jnp.float32)
    if Bp != B:
        x = jnp.zeros((T, Bp, INPUT_SIZE), jnp.float32).at[:, :B].set(x)
        h0_b = jnp.zeros((Bp, H), jnp.float32).at[:B].set(h0[0].astype(jnp.float32))
    else:
        h0_b = h0[0].astype(jnp.float32)

    # Hoisted input projection for all timesteps (one large-M matmul, biases folded).
    xproj = (x.reshape(T * Bp, INPUT_SIZE) @ packed["w_ih"]
             + packed["b_ih"]).reshape(T, Bp, N_GATES * GROUP)
    if Tp != T:
        xproj = jnp.zeros((Tp, Bp, N_GATES * GROUP), jnp.float32).at[:T].set(xproj)

    n_blocks = Tp // TT
    const = lambda shape: pl.BlockSpec(shape, lambda t: (0,) * len(shape))

    # --- serial recurrence: only h @ W_hh on the critical path ---
    h_all = pl.pallas_call(
        functools.partial(_gru_recurrence_kernel, tt=TT, hidden=H, group=GROUP),
        grid=(n_blocks,),
        out_shape=jax.ShapeDtypeStruct((Tp, Bp, H), jnp.float32),
        in_specs=[
            pl.BlockSpec((TT, Bp, N_GATES * GROUP), lambda t: (t, 0, 0)),  # xproj block
            const((Bp, H)),                                                # h0 (t==0 only)
            const(packed["w_hh"].shape),                                   # VMEM-resident
            const(packed["b_hn"].shape),
        ],
        out_specs=pl.BlockSpec((TT, Bp, H), lambda t: (t, 0, 0)),
        scratch_shapes=[pltpu.VMEM((Bp, H), jnp.float32)],                 # h carry
        compiler_params=pltpu.CompilerParams(
            dimension_semantics=("arbitrary",)),                           # sequential in T
    )(xproj, h0_b, packed["w_hh"], packed["b_hn"])

    # --- parallel head: Linear + log-softmax on all timesteps, lane-dense out ---
    logp_pad = pl.pallas_call(
        _head_kernel,
        grid=(n_blocks,),
        out_shape=jax.ShapeDtypeStruct((Tp, Bp, HEAD_PAD), jnp.float32),
        in_specs=[
            pl.BlockSpec((TT, Bp, H), lambda t: (t, 0, 0)),
            const(packed["w_head"].shape),
            const(packed["b_head"].shape),
        ],
        out_specs=pl.BlockSpec((TT, Bp, HEAD_PAD), lambda t: (t, 0, 0)),
        compiler_params=pltpu.CompilerParams(
            dimension_semantics=("parallel",)),
    )(h_all, packed["w_head"], packed["b_head"])

    out = logp_pad[:T, :B, :OUT_SIZE]
    hn = h_all[T - 1, :B][None]
    return out, hn


def gru_forward(x, h0, packed):
    """PyTorch-equivalent forward: x (B, 57), h0 (1, B, 64) -> ((1,B,18), (1,B,64))."""
    return gru_sequence(x[None], h0, packed)


def init_params(key):
    """Deterministic init mimicking PyTorch's uniform(-1/sqrt(H), 1/sqrt(H))."""
    k = jax.random.split(key, 6)
    bound = 1.0 / jnp.sqrt(jnp.float32(HIDDEN_SIZE))
    u = lambda kk, shape: jax.random.uniform(kk, shape, jnp.float32, -bound, bound)
    return {
        "w_ih": u(k[0], (3 * HIDDEN_SIZE, INPUT_SIZE)),
        "w_hh": u(k[1], (3 * HIDDEN_SIZE, HIDDEN_SIZE)),
        "b_ih": u(k[2], (3 * HIDDEN_SIZE,)),
        "b_hh": u(k[3], (3 * HIDDEN_SIZE,)),
        "w_lin": u(k[4], (OUT_SIZE, HIDDEN_SIZE)),
        "b_lin": u(k[5], (OUT_SIZE,)),
    }


def _reference(x_seq, h0, p):
    """Pure-JAX reference of the PyTorch module applied over a length-T sequence."""
    H = HIDDEN_SIZE

    def step(h, x):
        gi = x @ p["w_ih"].T + p["b_ih"]
        gh = h @ p["w_hh"].T + p["b_hh"]
        r = jax.nn.sigmoid(gi[:, :H] + gh[:, :H])
        z = jax.nn.sigmoid(gi[:, H:2 * H] + gh[:, H:2 * H])
        n = jnp.tanh(gi[:, 2 * H:] + r * gh[:, 2 * H:])
        h_new = (1.0 - z) * n + z * h
        logits = h_new @ p["w_lin"].T + p["b_lin"]
        return h_new, jax.nn.log_softmax(logits, axis=-1)

    h_t, outs = jax.lax.scan(step, h0[0], x_seq)
    return outs, h_t[None]


if __name__ == "__main__":
    key = jax.random.PRNGKey(0)
    kx, kh, kp, ks = jax.random.split(key, 4)

    B = 8
    params = init_params(kp)
    packed_bf16 = prepare_params(params, jnp.bfloat16)   # fast path (native MXU dtype)
    packed_f32 = prepare_params(params, jnp.float32)

    # --- single step: exactly the PyTorch module's forward (seq_len = 1) ---
    x = jax.random.normal(kx, (B, INPUT_SIZE), jnp.float32)
    h0 = jax.random.normal(kh, (1, B, HIDDEN_SIZE), jnp.float32)

    out, hn = gru_forward(x, h0, packed_bf16)
    out = jax.block_until_ready(out)
    hn = jax.block_until_ready(hn)

    ref_out, ref_hn = _reference(x[None], h0, params)
    assert out.shape == (1, B, OUT_SIZE)
    assert hn.shape == (1, B, HIDDEN_SIZE)
    assert jnp.allclose(out, ref_out, atol=5e-2, rtol=5e-2)
    assert jnp.allclose(hn, ref_hn, atol=5e-2, rtol=5e-2)

    out32, hn32 = gru_forward(x, h0, packed_f32)
    jax.block_until_ready(out32)
    assert jnp.allclose(out32, ref_out, atol=1e-4, rtol=1e-4)
    assert jnp.allclose(hn32, ref_hn, atol=1e-4, rtol=1e-4)

    # --- short multi-step sequence (single time block, bf16 path) ---
    T = 4
    xs = jax.random.normal(ks, (T, B, INPUT_SIZE), jnp.float32)
    out_seq, hn_seq = gru_sequence(xs, h0, packed_bf16)
    out_seq = jax.block_until_ready(out_seq)
    ref_seq, ref_hT = _reference(xs, h0, params)
    assert out_seq.shape == (T, B, OUT_SIZE)
    assert jnp.allclose(out_seq, ref_seq, atol=5e-2, rtol=5e-2)
    assert jnp.allclose(hn_seq, ref_hT, atol=5e-2, rtol=5e-2)

    # --- long sequence: multiple time blocks + T padding (f32 path, tight tol) ---
    T_long = 40
    xs_long = jax.random.normal(ks, (T_long, B, INPUT_SIZE), jnp.float32)
    out_l, hn_l = gru_sequence(xs_long, h0, packed_f32, time_block=16)
    out_l = jax.block_until_ready(out_l)
    ref_l, ref_hl = _reference(xs_long, h0, params)
    assert out_l.shape == (T_long, B, OUT_SIZE)
    assert jnp.allclose(out_l, ref_l, atol=1e-3, rtol=1e-3)
    assert jnp.allclose(hn_l, ref_hl, atol=1e-3, rtol=1e-3)

    print("KERNEL_OK")
</pallas_src>

<mosaic_0001>
module attributes {stable_mosaic.version = 11 : i64} {
  func.func @_gru_recurrence_kernel(%arg0: i32, %arg1: memref<1x8x384xf32, #tpu.memory_space<vmem>>, %arg2: memref<8x64xf32, #tpu.memory_space<vmem>>, %arg3: memref<64x384xbf16, #tpu.memory_space<vmem>>, %arg4: memref<1x64xf32, #tpu.memory_space<vmem>>, %arg5: memref<1x8x64xf32, #tpu.memory_space<vmem>>, %arg6: memref<8x64xf32, #tpu.memory_space<vmem>>) attributes {dimension_semantics = [#tpu.dimension_semantics<arbitrary>], iteration_bounds = array<i64: 1>, scalar_prefetch = 0 : i64, scratch_operands = 1 : i64, tpu.core_type = #tpu.core_type<tc>, window_params = [{transform_indices = @transform_0, window_bounds = array<i64: 1, 8, 384>}, {pipeline_mode = #tpu.pipeline_mode<synchronous>, transform_indices = @transform_1, window_bounds = array<i64: 8, 64>}, {pipeline_mode = #tpu.pipeline_mode<synchronous>, transform_indices = @transform_2, window_bounds = array<i64: 64, 384>}, {pipeline_mode = #tpu.pipeline_mode<synchronous>, transform_indices = @transform_3, window_bounds = array<i64: 1, 64>}, {transform_indices = @transform_4, window_bounds = array<i64: 1, 8, 64>}]} {
    %c0_i32 = arith.constant 0 : i32
    %0 = arith.cmpi eq, %arg0, %c0_i32 : i32
    %1 = arith.extui %0 : i1 to i32
    %c0_i32_0 = arith.constant 0 : i32
    %2 = arith.cmpi ne, %1, %c0_i32_0 : i32
    scf.if %2 {
      %c0_16 = arith.constant 0 : index
      %c0_17 = arith.constant 0 : index
      %44 = vector.load %arg2[%c0_16, %c0_17] : memref<8x64xf32, #tpu.memory_space<vmem>>, vector<8x64xf32>
      %c0_18 = arith.constant 0 : index
      %c0_19 = arith.constant 0 : index
      %45 = vector.load %arg6[%c0_18, %c0_19] : memref<8x64xf32, #tpu.memory_space<vmem>>, vector<8x64xf32>
      tpu.vector_store %arg6[%c0_18, %c0_19], %44 {strides = array<i32>} : memref<8x64xf32, #tpu.memory_space<vmem>>, vector<8x64xf32>,
    } else {
    }
    %c0 = arith.constant 0 : index
    %c0_1 = arith.constant 0 : index
    %3 = vector.load %arg3[%c0, %c0_1] : memref<64x384xbf16, #tpu.memory_space<vmem>>, vector<64x384xbf16>
    %c0_2 = arith.constant 0 : index
    %c0_3 = arith.constant 0 : index
    %4 = vector.load %arg4[%c0_2, %c0_3] : memref<1x64xf32, #tpu.memory_space<vmem>>, vector<1x64xf32>
    %c0_4 = arith.constant 0 : index
    %c0_5 = arith.constant 0 : index
    %5 = vector.load %arg6[%c0_4, %c0_5] : memref<8x64xf32, #tpu.memory_space<vmem>>, vector<8x64xf32>
    %c0_i32_6 = arith.constant 0 : i32
    %6 = arith.index_cast %c0_i32_6 : i32 to index
    %c0_7 = arith.constant 0 : index
    %c0_8 = arith.constant 0 : index
    %7 = vector.load %arg1[%6, %c0_7, %c0_8] : memref<1x8x384xf32, #tpu.memory_space<vmem>>, vector<1x8x384xf32>
    %8 = vector.shape_cast %7 : vector<1x8x384xf32> to vector<8x384xf32>
    %9 = arith.truncf %5 : vector<8x64xf32> to vector<8x64xbf16>
    %cst = arith.constant dense<0.000000e+00> : vector<8x384xf32>
    %10 = tpu.matmul %9, %3, %cst {dimension_numbers = #tpu.dot_dimension_numbers<[1], [0], [0], [1], [0, 0, 1, 1], [], []>} : vector<8x64xbf16>, vector<64x384xbf16>, vector<8x384xf32> -> vector<8x384xf32>
    %11 = vector.extract_strided_slice %8 {offsets = [0, 0], sizes = [8, 64], strides = [1, 1]} : vector<8x384xf32> to vector<8x64xf32>
    %12 = vector.extract_strided_slice %10 {offsets = [0, 0], sizes = [8, 64], strides = [1, 1]} : vector<8x384xf32> to vector<8x64xf32>
    %13 = arith.addf %11, %12 : vector<8x64xf32>
    %14 = arith.negf %13 : vector<8x64xf32>
    %15 = math.exp %14 : vector<8x64xf32>
    %cst_9 = arith.constant 1.000000e+00 : f32
    %16 = vector.broadcast %cst_9 : f32 to vector<8x64xf32>
    %17 = arith.addf %16, %15 : vector<8x64xf32>
    %18 = arith.divf %16, %17 : vector<8x64xf32>
    %19 = vector.extract_strided_slice %8 {offsets = [0, 128], sizes = [8, 64], strides = [1, 1]} : vector<8x384xf32> to vector<8x64xf32>
    %20 = vector.extract_strided_slice %10 {offsets = [0, 128], sizes = [8, 64], strides = [1, 1]} : vector<8x384xf32> to vector<8x64xf32>
    %21 = arith.addf %19, %20 : vector<8x64xf32>
    %22 = arith.negf %21 : vector<8x64xf32>
    %23 = math.exp %22 : vector<8x64xf32>
    %cst_10 = arith.constant 1.000000e+00 : f32
    %24 = vector.broadcast %cst_10 : f32 to vector<8x64xf32>
    %25 = arith.addf %24, %23 : vector<8x64xf32>
    %26 = arith.divf %24, %25 : vector<8x64xf32>
    %27 = vector.extract_strided_slice %10 {offsets = [0, 256], sizes = [8, 64], strides = [1, 1]} : vector<8x384xf32> to vector<8x64xf32>
    %28 = vector.broadcast %4 : vector<1x64xf32> to vector<8x64xf32>
    %29 = arith.addf %27, %28 : vector<8x64xf32>
    %30 = vector.extract_strided_slice %8 {offsets = [0, 256], sizes = [8, 64], strides = [1, 1]} : vector<8x384xf32> to vector<8x64xf32>
    %31 = arith.mulf %18, %29 : vector<8x64xf32>
    %32 = arith.addf %30, %31 : vector<8x64xf32>
    %33 = math.tanh %32 : vector<8x64xf32>
    %cst_11 = arith.constant 1.000000e+00 : f32
    %34 = vector.broadcast %cst_11 : f32 to vector<8x64xf32>
    %35 = arith.subf %34, %26 : vector<8x64xf32>
    %36 = arith.mulf %35, %33 : vector<8x64xf32>
    %37 = arith.mulf %26, %5 : vector<8x64xf32>
    %38 = arith.addf %36, %37 : vector<8x64xf32>
    %39 = arith.index_cast %c0_i32_6 : i32 to index
    %c0_12 = arith.constant 0 : index
    %c0_13 = arith.constant 0 : index
    %40 = vector.load %arg5[%39, %c0_12, %c0_13] : memref<1x8x64xf32, #tpu.memory_space<vmem>>, vector<1x8x64xf32>
    %41 = vector.shape_cast %40 : vector<1x8x64xf32> to vector<8x64xf32>
    %42 = vector.shape_cast %38 : vector<8x64xf32> to vector<1x8x64xf32>
    tpu.vector_store %arg5[%39, %c0_12, %c0_13], %42 {strides = array<i32>} : memref<1x8x64xf32, #tpu.memory_space<vmem>>, vector<1x8x64xf32>,
    %c1_i32 = arith.constant 1 : i32
    %c0_14 = arith.constant 0 : index
    %c0_15 = arith.constant 0 : index
    %43 = vector.load %arg6[%c0_14, %c0_15] : memref<8x64xf32, #tpu.memory_space<vmem>>, vector<8x64xf32>
    tpu.vector_store %arg6[%c0_14, %c0_15], %38 {strides = array<i32>} : memref<8x64xf32, #tpu.memory_space<vmem>>, vector<8x64xf32>,
    return
  }
  func.func @transform_0(%arg0: i32) -> (i32, i32, i32) {
    %c0_i32 = arith.constant 0 : i32
    %c0_i32_0 = arith.constant 0 : i32
    %c0_i32_1 = arith.constant 0 : i32
    return %arg0, %c0_i32, %c0_i32_0 : i32, i32, i32
  }
  func.func @transform_1(%arg0: i32) -> (i32, i32) {
    %c0_i32 = arith.constant 0 : i32
    %c0_i32_0 = arith.constant 0 : i32
    %c0_i32_1 = arith.constant 0 : i32
    return %c0_i32, %c0_i32_0 : i32, i32
  }
  func.func @transform_2(%arg0: i32) -> (i32, i32) {
    %c0_i32 = arith.constant 0 : i32
    %c0_i32_0 = arith.constant 0 : i32
    %c0_i32_1 = arith.constant 0 : i32
    return %c0_i32, %c0_i32_0 : i32, i32
  }
  func.func @transform_3(%arg0: i32) -> (i32, i32) {
    %c0_i32 = arith.constant 0 : i32
    %c0_i32_0 = arith.constant 0 : i32
    %c0_i32_1 = arith.constant 0 : i32
    return %c0_i32, %c0_i32_0 : i32, i32
  }
  func.func @transform_4(%arg0: i32) -> (i32, i32, i32) {
    %c0_i32 = arith.constant 0 : i32
    %c0_i32_0 = arith.constant 0 : i32
    %c0_i32_1 = arith.constant 0 : i32
    return %arg0, %c0_i32, %c0_i32_0 : i32, i32, i32
  }
}

</mosaic_0001>

<bundles_post_ra>
// kernel: tpu_custom_call.1
= control target key start
LH: loop header
LB: loop body
LE: loop exit
PB: predicated region body
PF: predicated region fallthrough
CT: control target
= control target key end

     0   :  { %9 = vsyncpa [#allocation4], 0  ;;  %s489_s0 = inlined_call_operand.hbm [shape: f32[1,8,384], index: 0, kind: input, shape index: {}]   ;;  %s490_s1 = inlined_call_operand.hbm [shape: f32[8,64], index: 1, kind: input, shape index: {}]   ;;  %s491_s2 = inlined_call_operand.hbm [shape: bf16[64,384], index: 2, kind: input, shape index: {}]   ;;  %s492_s3 = inlined_call_operand.vmem [shape: f32[1,64], index: 3, kind: input, shape index: {}]   ;;  %s493_s4 = inlined_call_operand.hbm [shape: f32[1,8,64], index: 4, kind: output, shape index: {}]  }
   0x1   :  { %10 = vsyncpa [#allocation7], 0 }
   0x2   :  { %11 = vsyncpa [#allocation5], 0  ;;  %s435_s15 = smov [#allocation6]   ;;  %s436_s17 = smov [#allocation3]  }
   0x3   :  { %s28_s16 = sshll.u32 %s435_s15, 4  ;;  %s18_s18 = sshll.u32 %s436_s17, 4  ;;  %s29_s16 = int_to_ptr.vmem [resolvable:$true] %s28_s16  ;;  %s19_s18 = int_to_ptr.vmem [resolvable:$true] %s18_s18 }
   0x4   :  { %s357_s19 = scalar_lea.vmem %s29_s16, 128  ;;  %p362_p1 = scmp.lt.s32.totalorder %s29_s16, %s29_s16 }
   0x5   :  { %p358_p0 = scmp.ne.s32.totalorder %s29_s16, %s357_s19  ;;  %p363_p2 = scmp.lt.s32.totalorder %s357_s19, %s357_s19 }
   0x7   :  { %p364_p3 = por %p363_p2, %p362_p1 }
   0x9   :  { %p365_p4 = pnand %p364_p3, %p358_p0 }
   0xb   :  { %368 = shalt.err (!%p365_p4)
}
   0xc   :  { %31 = dma.hbm_to_vmem [thread:$0]  %s490_s1, 128, %s29_s16, [#allocation7]  }
   0xd   :  { %s377_s22 = scalar_lea.vmem %s19_s18, 384  ;;  %p382_p6 = scmp.lt.s32.totalorder %s19_s18, %s19_s18 }
   0xe   :  { %p378_p5 = scmp.ne.s32.totalorder %s19_s18, %s377_s22  ;;  %p383_p7 = scmp.lt.s32.totalorder %s377_s22, %s377_s22 }
  0x10   :  { %p384_p8 = por %p383_p7, %p382_p6 }
  0x12   :  { %p385_p9 = pnand %p384_p8, %p378_p5 }
  0x14   :  { %388 = shalt.err (!%p385_p9)
}
  0x15   :  { %21 = dma.hbm_to_vmem [thread:$0]  %s489_s0, 384, %s19_s18, [#allocation4]  }
  0x16   :  { %s437_s25 = smov [#allocation8]  }
  0x17   :  { %s37_s26 = sshll.u32 %s437_s25, 4  ;;  %s38_s26 = int_to_ptr.vmem [resolvable:$true] %s37_s26 }
  0x18   :  { %s397_s27 = scalar_lea.vmem %s38_s26, 1536  ;;  %p402_p11 = scmp.lt.s32.totalorder %s38_s26, %s38_s26 }
  0x19   :  { %p398_p10 = scmp.ne.s32.totalorder %s38_s26, %s397_s27  ;;  %p403_p12 = scmp.lt.s32.totalorder %s397_s27, %s397_s27 }
  0x1b   :  { %p404_p13 = por %p403_p12, %p402_p11 }
  0x1d   :  { %p405_p0 = pnand %p404_p13, %p398_p10 }
  0x1f   :  { %408 = shalt.err (!%p405_p0)
}
  0x20   :  { %s438_s1 = smov 192   ;;  %s439_s28 = smov 12  }
  0x21   :  { %43 = dma.hbm_to_vmem [thread:$0]  %s491_s2, 1536, %s38_s26, [#allocation7], %s438_s1, %s438_s1, %s439_s28  }
  0x22   :  { %429 = dma.done.wait [#allocation4], 384  }
  0x23   :  { %430 = vsyncadd [#allocation4], 4294966912 }
  0x24   :  { %431 = dma.done.wait [#allocation7], 1664  }
  0x25   :  { %432 = vsyncadd [#allocation7], 4294965632  ;;  %v440_v0 = vmov 0   ;;  %v441_v1 = vmov 0.0   ;;  %vm442_vm0 = vmmov 0   ;;  %vm61_vm1 = vcmask 523264  }
  0x26   :  { %185 = vmatprep.mubr.bf16.mxu0 %v440_v0  ;;  %302 = vmatprep.subr.bf16.mxu1 %v441_v1  ;;  %v323_v2 = vld [vmem:[#allocation8 + $0x4c] ss:$12 sps:$4 sm:$0xff]   ;;  %v325_v3 = vld [vmem:[#allocation8 + $0x48] ss:$12 sps:$4 sm:$0xff]   ;;  %v328_v5 = vld [vmem:[#allocation8 + $0x30] ss:$12 sps:$4 sm:$0xff]  }
  0x27   :  { %310 = vmatprep.mubr.msk.bf16.mxu1 %vm442_vm0, %v441_v1  ;;  %161 = vmatprep.subr.bf16.mxu0 %v323_v2  ;;  %v326_v4 = vld [vmem:[#allocation8 + $0x34] ss:$12 sps:$4 sm:$0xff]   ;;  %v329_v6 = vld [vmem:[#allocation8 + $0x1c] ss:$12 sps:$4 sm:$0xff]   ;;  %v331_v7 = vld [vmem:[#allocation8 + $0x18] ss:$12 sps:$4 sm:$0xff]  }
  0x28   :  { %162 = vmatpush1.bf16.msra.mxu0 %v325_v3  ;;  %v60_v8 = vld [vmem:[#allocation6] sm:$0xff]  ;;  %v332_v10 = vld [vmem:[#allocation8 + $0x4] ss:$12 sps:$4 sm:$0xff]   ;;  %v334_v12 = vld [vmem:[#allocation8] ss:$12 sps:$4 sm:$0xff]   ;;  %s443_s5 = smov [#allocation9]  }
  0x29   :  { %163 = vmatprep.subr.bf16.mxu0 %v326_v4  ;;  %62 = vst.msk [vmem:[#allocation2] sm:$0xff] %vm61_vm1, %v60_v8  ;;  %v335_v9 = vld [vmem:[#allocation8 + $0x50] ss:$12 sps:$4 sm:$0xff]   ;;  %v336_v11 = vld [vmem:[#allocation8 + $0x38] ss:$12 sps:$4 sm:$0xff]   ;;  %v82_v22 = vld [vmem:[#allocation3 + $0x8] sm:$0xff] }
  0x2a   :  { %303 = vmatpush3.bf16.msra.mxu1 %v335_v9  ;;  %v337_v13 = vld [vmem:[#allocation8 + $0x20] ss:$12 sps:$4 sm:$0xff]   ;;  %v338_v16 = vld [vmem:[#allocation8 + $0x8] ss:$12 sps:$4 sm:$0xff]   ;;  %v296_v34 = vld [vmem:[%s492_s3] ss:$0 sm:$0xff] }
  0x2b   :  { %304 = vmatprep.subr.bf16.mxu1 %v441_v1  ;;  %v81_v17 = vld [vmem:[#allocation3] sm:$0xff]  ;;  %v83_v38 = vld [vmem:[#allocation3 + $0x10] sm:$0xff]  ;;  %s270_s6 = sshll.u32 %s443_s5, 4  ;;  %s271_s6 = int_to_ptr.vmem [resolvable:$true] %s270_s6 }
  0x2c   :  { %164 = vmatpush1.bf16.msra.mxu0 %v328_v5  ;;  %s409_s3 = scalar_lea.vmem %s271_s6, 128  ;;  %p414_p2 = scmp.lt.s32.totalorder %s271_s6, %s271_s6 }
  0x2d   :  { %165 = vmatprep.subr.bf16.mxu0 %v329_v6  ;;  %p410_p1 = scmp.ne.s32.totalorder %s271_s6, %s409_s3  ;;  %p415_p3 = scmp.lt.s32.totalorder %s409_s3, %s409_s3 }
  0x2e   :  { %305 = vmatpush3.bf16.msra.mxu1 %v336_v11 }
  0x2f   :  { %306 = vmatprep.subr.bf16.mxu1 %v441_v1  ;;  %p416_p4 = por %p415_p3, %p414_p2 }
  0x30   :  { %166 = vmatpush1.bf16.msra.mxu0 %v331_v7  ;;  %v80_v14 = vld [vmem:[#allocation2] sm:$0xff] }
  0x31   :  { %167 = vmatprep.subr.bf16.mxu0 %v332_v10  ;;  %v84_v15 = vpack.c.bf16 %v80_v14, %v80_v14  ;;  %p417_p5 = pnand %p416_p4, %p410_p1 }
  0x32   :  { %307 = vmatpush3.bf16.msra.mxu1 %v337_v13 }
  0x33   :  { %308 = vmatprep.subr.bf16.mxu1 %v441_v1 }
  0x34   :  { %168 = vmatpush1.bf16.msra.mxu0 %v334_v12 }
  0x36   :  { %309 = vmatpush3.bf16.msra.mxu1 %v338_v16 }
  0x37   :  { %292 = vmatmul.mubr.msk.bf16.vlgmr.msra.gmra.mxu0 %vm61_vm1, %v84_v15 }
  0x39   :  { %311 = vmatmul.mubr.msk.bf16.vlgmr.msra.gmra.mxu1 %vm61_vm1, %v84_v15 }
  0xf7   :  { %v187_v18 = vpop.f32.mrf.mxu0 }
  0xf8   :  { %v234_v19 = vadd.f32 %v187_v18, %v81_v17 }
  0xf9   :  { %v189_v20 = vpop.f32.mrf.mxu0  ;;  %v228_v24 = vpop.f32.mrf.mxu1 }
  0xfa   :  { %v294_v21 = vmul.f32 -1.442695, %v234_v19  ;;  %v241_v26 = vadd.f32 %v189_v20, %v82_v22  ;;  %v254_v36 = vadd.f32 %v296_v34, %v228_v24 }
  0xfb   :  { %v191_v23 = vpop.f32.mrf.mxu0  ;;  %v312_v27 = vpop.f32.mrf.mxu1 }
  0xfc   :  { %339 = vpow2.f32 %v294_v21  ;;  %v295_v29 = vmul.f32 -1.442695, %v241_v26 }
  0xfd   :  { %v192_v25 = vpop.f32.mrf.mxu0  ;;  %v231_v28 = vpop.f32.mrf.mxu1 }
  0xfe   :  { %341 = vpow2.f32 %v295_v29 }
  0xff   :  { %v313_v30 = vpop.f32.mrf.mxu1 }
 0x109   :  { %v340_v31 = vpop.eup %339 }
 0x10a   :  { %v238_v32 = vadd.f32 1.0, %v340_v31 }
 0x10b   :  { %v342_v33 = vpop.eup %341 }
 0x10c   :  { %343 = vrcp.f32 %v238_v32  ;;  %v245_v35 = vadd.f32 1.0, %v342_v33 }
 0x10e   :  { %345 = vrcp.f32 %v245_v35 }
 0x119   :  { %v344_v37 = vpop.eup %343 }
 0x11a   :  { %v255_v39 = vmul.f32 %v344_v37, %v254_v36 }
 0x11b   :  { %v346_v41 = vpop.eup %345 }
 0x11c   :  { %v256_v40 = vadd.f32 %v255_v39, %v83_v38  ;;  %v258_v42 = vsub.f32 1.0, %v346_v41  ;;  %v260_v45 = vmul.f32 %v346_v41, %v80_v14 }
 0x11e   :  { %347 = vtanh.f32 %v256_v40 }
 0x12b   :  { %v348_v43 = vpop.eup %347 }
 0x12c   :  { %v259_v44 = vmul.f32 %v348_v43, %v258_v42 }
 0x12e   :  { %v261_v46 = vadd.f32 %v260_v45, %v259_v44 }
 0x130   :  { %262 = vst.msk [vmem:[#allocation9] sm:$0xff] %vm61_vm1, %v261_v46  ;;  %263 = vst.msk [vmem:[#allocation2] sm:$0xff] %vm61_vm1, %v261_v46 }
 0x131   :  { %420 = shalt.err (!%p417_p5)
}
 0x132   :  { %273 = dma.vmem_to_hbm [thread:$0]  %s271_s6, 128, %s493_s4, [#allocation5]  }
 0x133   :  { %433 = dma.done.wait [#allocation5], 128  }
 0x134   :  { %434 = vsyncadd [#allocation5], 4294967168 }
 0x135   :  { %277 = vsyncpa [#allocation4], 1 }
 0x136   :  { %278 = vsyncpa [#allocation7], 1 }
 0x137   :  { %279 = vsyncpa [#allocation5], 1 }

</bundles_post_ra>
